<compile_context>
chip_gen: v5e
topology: v5e:2x2
jax: 0.10.0
libtpu: 0.0.40
codegen_flags: <defaults>
</compile_context>

<pallas_src>
import jax
import jax.numpy as jnp
from jax.experimental import pallas as pl
from jax.experimental.pallas import tpu as pltpu
import numpy as np


IN_FEATURES = 3 * 28 * 28   # 2352
HIDDEN = 100
NUM_CLASSES = 2
LANE = 128                  # hidden / class dims padded to full lane width
NEG_BIG = -1e30             # pre-baked "mask" for padded class columns


# ----------------------------------------------------------------------------
# Kernel: fused Linear -> ReLU -> Linear -> softmax for one batch tile
# ----------------------------------------------------------------------------
def discriminator_kernel(x_ref, w1_ref, b1_ref, w2_ref, b2_ref, o_ref):
    """x_ref : (BN, K)   bf16 input rows
       w1_ref: (K, Hp)   bf16 layer-1 weight, hidden padded to 128 lanes
       b1_ref: (1, Hp)   f32 layer-1 bias (padded with 0)
       w2_ref: (Hp, Cp)  bf16 layer-2 weight, classes padded to 128 lanes
       b2_ref: (1, Cp)   f32 layer-2 bias (padded columns pre-set to -1e30)
       o_ref : (BN, Cp)  f32 softmax probabilities (valid in first 2 cols)
    """
    # Linear 1: bf16 MXU matmul, f32 accumulate; bias + ReLU on the VPU.
    h = jnp.dot(x_ref[...], w1_ref[...], preferred_element_type=jnp.float32)
    h = jnp.maximum(h + b1_ref[...], 0.0)

    # Linear 2 (+ bias).  Padded hidden cols of h are exactly 0; padded class
    # columns get the -1e30 baked into b2 -> exp underflows to 0 in softmax.
    logits = jnp.dot(h.astype(w2_ref.dtype), w2_ref[...],
                     preferred_element_type=jnp.float32)
    logits = logits + b2_ref[...]

    # Numerically-stable softmax over the class (lane) axis.
    m = jnp.max(logits, axis=-1, keepdims=True)
    e = jnp.exp(logits - m)
    s = jnp.sum(e, axis=-1, keepdims=True)
    o_ref[...] = (e * pl.reciprocal(s, approx=True)).astype(o_ref.dtype)


# ----------------------------------------------------------------------------
# Parameter packing (done once, outside the forward)
# ----------------------------------------------------------------------------
def pack_params(w1, b1, w2, b2):
    """PyTorch Linear weights (out, in) -> bf16 padded (in, out_padded) operands."""
    K = w1.shape[1]
    w1p = jnp.zeros((K, LANE), jnp.bfloat16).at[:, :HIDDEN].set(
        w1.T.astype(jnp.bfloat16))
    b1p = jnp.zeros((1, LANE), jnp.float32).at[:, :HIDDEN].set(
        b1.astype(jnp.float32))
    w2p = jnp.zeros((LANE, LANE), jnp.bfloat16).at[:HIDDEN, :NUM_CLASSES].set(
        w2.T.astype(jnp.bfloat16))
    # Padded class columns pre-biased to -1e30 (replaces in-kernel masking).
    b2p = jnp.full((1, LANE), NEG_BIG, jnp.float32).at[:, :NUM_CLASSES].set(
        b2.astype(jnp.float32))
    return w1p, b1p, w2p, b2p


# ----------------------------------------------------------------------------
# Forward
# ----------------------------------------------------------------------------
def discriminator_forward(x, alpha, packed, *, block_n=512):
    # ReverseLayerF is the identity in the forward pass; alpha only scales the
    # backward gradient.
    # TODO(synk): gradient-reversal backward (scale grads by -alpha) not implemented.
    del alpha
    w1p, b1p, w2p, b2p = packed
    N, K = x.shape
    Hp = w1p.shape[1]
    Cp = w2p.shape[1]

    # Batch tiling: pad only to a multiple of 8 sublanes; tile = min(block_n, that).
    n8 = ((N + 7) // 8) * 8
    bn = min(block_n, n8)
    pad_n = ((N + bn - 1) // bn) * bn

    xb = x.astype(jnp.bfloat16)                       # bf16 activations (once)
    xp = xb if pad_n == N else jnp.pad(xb, ((0, pad_n - N), (0, 0)))

    cost = pl.CostEstimate(
        flops=2 * pad_n * K * Hp + 2 * pad_n * Hp * Cp,
        transcendentals=pad_n * Cp,
        bytes_accessed=pad_n * K * 2 + K * Hp * 2 + Hp * Cp * 2
                       + 2 * Hp * 4 + pad_n * Cp * 4,
    )

    out = pl.pallas_call(
        discriminator_kernel,
        out_shape=jax.ShapeDtypeStruct((pad_n, Cp), jnp.float32),
        grid=(pad_n // bn,),
        in_specs=[
            # batch tile of inputs (double-buffered by default)
            pl.BlockSpec((bn, K), lambda i: (i, 0)),
            # grid-invariant weights/biases: single-buffered to save VMEM
            pl.BlockSpec((K, Hp), lambda i: (0, 0), pipeline_mode=pl.Buffered(1)),
            pl.BlockSpec((1, Hp), lambda i: (0, 0), pipeline_mode=pl.Buffered(1)),
            pl.BlockSpec((Hp, Cp), lambda i: (0, 0), pipeline_mode=pl.Buffered(1)),
            pl.BlockSpec((1, Cp), lambda i: (0, 0), pipeline_mode=pl.Buffered(1)),
        ],
        out_specs=pl.BlockSpec((bn, Cp), lambda i: (i, 0)),
        compiler_params=pltpu.CompilerParams(dimension_semantics=("parallel",)),
        cost_estimate=cost,
    )(xp, w1p, b1p, w2p, b2p)

    return out[:N, :NUM_CLASSES]


# ----------------------------------------------------------------------------
# Pure-JAX reference (correctness check only)
# ----------------------------------------------------------------------------
def reference_forward(x, alpha, params):
    del alpha  # identity in forward
    w1, b1, w2, b2 = params
    h = jnp.maximum(x @ w1.T + b1, 0.0)
    logits = h @ w2.T + b2
    return jax.nn.softmax(logits, axis=1)


if __name__ == "__main__":
    key = jax.random.PRNGKey(0)
    k1, k2, k3, k4, kx = jax.random.split(key, 5)

    # Deterministic synthetic parameters (PyTorch nn.Linear layout: (out, in))
    w1 = jax.random.normal(k1, (HIDDEN, IN_FEATURES), jnp.float32) * 0.02
    b1 = jax.random.normal(k2, (HIDDEN,), jnp.float32) * 0.02
    w2 = jax.random.normal(k3, (NUM_CLASSES, HIDDEN), jnp.float32) * 0.1
    b2 = jax.random.normal(k4, (NUM_CLASSES,), jnp.float32) * 0.1
    params = (w1, b1, w2, b2)

    # Input features: the first Linear pins the feature size to 3*28*28 = 2352
    x = jax.random.normal(kx, (2, IN_FEATURES), jnp.float32)
    alpha = jnp.float32(0.7)

    packed = pack_params(*params)                       # hoisted, done once
    out = jax.jit(discriminator_forward)(x, alpha, packed)
    out = jax.block_until_ready(out)
    assert out.shape == (2, NUM_CLASSES), out.shape

    ref = jax.block_until_ready(reference_forward(x, alpha, params))
    # bf16 operands (f32 accumulation) + approx reciprocal -> slightly looser tol
    np.testing.assert_allclose(np.asarray(out), np.asarray(ref), rtol=2e-2, atol=2e-2)

    print("KERNEL_OK")
</pallas_src>

<mosaic_0001>
module attributes {stable_mosaic.version = 11 : i64} {
  func.func @discriminator_kernel(%arg0: i32, %arg1: memref<8x2352xbf16, #tpu.memory_space<vmem>>, %arg2: memref<2352x128xbf16, #tpu.memory_space<vmem>>, %arg3: memref<1x128xf32, #tpu.memory_space<vmem>>, %arg4: memref<128x128xbf16, #tpu.memory_space<vmem>>, %arg5: memref<1x128xf32, #tpu.memory_space<vmem>>, %arg6: memref<8x128xf32, #tpu.memory_space<vmem>>) attributes {dimension_semantics = [#tpu.dimension_semantics<parallel>], iteration_bounds = array<i64: 1>, scalar_prefetch = 0 : i64, scratch_operands = 0 : i64, tpu.core_type = #tpu.core_type<tc>, window_params = [{transform_indices = @transform_0, window_bounds = array<i64: 8, 2352>}, {pipeline_mode = #tpu.pipeline_mode<synchronous>, transform_indices = @transform_1, window_bounds = array<i64: 2352, 128>}, {pipeline_mode = #tpu.pipeline_mode<synchronous>, transform_indices = @transform_2, window_bounds = array<i64: 1, 128>}, {pipeline_mode = #tpu.pipeline_mode<synchronous>, transform_indices = @transform_3, window_bounds = array<i64: 128, 128>}, {pipeline_mode = #tpu.pipeline_mode<synchronous>, transform_indices = @transform_4, window_bounds = array<i64: 1, 128>}, {transform_indices = @transform_5, window_bounds = array<i64: 8, 128>}]} {
    %c0 = arith.constant 0 : index
    %c0_0 = arith.constant 0 : index
    %0 = vector.load %arg1[%c0, %c0_0] : memref<8x2352xbf16, #tpu.memory_space<vmem>>, vector<8x2352xbf16>
    %c0_1 = arith.constant 0 : index
    %c0_2 = arith.constant 0 : index
    %1 = vector.load %arg2[%c0_1, %c0_2] : memref<2352x128xbf16, #tpu.memory_space<vmem>>, vector<2352x128xbf16>
    %cst = arith.constant dense<0.000000e+00> : vector<8x128xf32>
    %2 = tpu.matmul %0, %1, %cst {dimension_numbers = #tpu.dot_dimension_numbers<[1], [0], [0], [1], [0, 0, 1, 1], [], []>} : vector<8x2352xbf16>, vector<2352x128xbf16>, vector<8x128xf32> -> vector<8x128xf32>
    %c0_3 = arith.constant 0 : index
    %c0_4 = arith.constant 0 : index
    %3 = vector.load %arg3[%c0_3, %c0_4] : memref<1x128xf32, #tpu.memory_space<vmem>>, vector<1x128xf32>
    %4 = vector.broadcast %3 : vector<1x128xf32> to vector<8x128xf32>
    %5 = arith.addf %2, %4 : vector<8x128xf32>
    %cst_5 = arith.constant 0.000000e+00 : f32
    %6 = vector.broadcast %cst_5 : f32 to vector<8x128xf32>
    %7 = arith.maximumf %5, %6 : vector<8x128xf32>
    %8 = arith.truncf %7 : vector<8x128xf32> to vector<8x128xbf16>
    %c0_6 = arith.constant 0 : index
    %c0_7 = arith.constant 0 : index
    %9 = vector.load %arg4[%c0_6, %c0_7] : memref<128x128xbf16, #tpu.memory_space<vmem>>, vector<128x128xbf16>
    %cst_8 = arith.constant dense<0.000000e+00> : vector<8x128xf32>
    %10 = tpu.matmul %8, %9, %cst_8 {dimension_numbers = #tpu.dot_dimension_numbers<[1], [0], [0], [1], [0, 0, 1, 1], [], []>} : vector<8x128xbf16>, vector<128x128xbf16>, vector<8x128xf32> -> vector<8x128xf32>
    %c0_9 = arith.constant 0 : index
    %c0_10 = arith.constant 0 : index
    %11 = vector.load %arg5[%c0_9, %c0_10] : memref<1x128xf32, #tpu.memory_space<vmem>>, vector<1x128xf32>
    %12 = vector.broadcast %11 : vector<1x128xf32> to vector<8x128xf32>
    %13 = arith.addf %10, %12 : vector<8x128xf32>
    %cst_11 = arith.constant dense<0xFF800000> : vector<8xf32>
    %14 = vector.multi_reduction <maximumf>, %13, %cst_11 [1] : vector<8x128xf32> to vector<8xf32>
    %15 = vector.shape_cast %14 : vector<8xf32> to vector<8x1xf32>
    %16 = vector.broadcast %15 : vector<8x1xf32> to vector<8x128xf32>
    %17 = arith.subf %13, %16 : vector<8x128xf32>
    %18 = math.exp %17 : vector<8x128xf32>
    %cst_12 = arith.constant dense<0.000000e+00> : vector<8xf32>
    %19 = vector.multi_reduction <add>, %18, %cst_12 [1] : vector<8x128xf32> to vector<8xf32>
    %20 = vector.shape_cast %19 : vector<8xf32> to vector<8x1xf32>
    %21 = tpu.reciprocal %20 {approx = true} : vector<8x1xf32> -> vector<8x1xf32>
    %22 = vector.broadcast %21 : vector<8x1xf32> to vector<8x128xf32>
    %23 = arith.mulf %18, %22 : vector<8x128xf32>
    %c0_13 = arith.constant 0 : index
    %c0_14 = arith.constant 0 : index
    %24 = vector.load %arg6[%c0_13, %c0_14] : memref<8x128xf32, #tpu.memory_space<vmem>>, vector<8x128xf32>
    tpu.vector_store %arg6[%c0_13, %c0_14], %23 {strides = array<i32>} : memref<8x128xf32, #tpu.memory_space<vmem>>, vector<8x128xf32>,
    return
  }
  func.func @transform_0(%arg0: i32) -> (i32, i32) {
    %c0_i32 = arith.constant 0 : i32
    %c0_i32_0 = arith.constant 0 : i32
    return %arg0, %c0_i32 : i32, i32
  }
  func.func @transform_1(%arg0: i32) -> (i32, i32) {
    %c0_i32 = arith.constant 0 : i32
    %c0_i32_0 = arith.constant 0 : i32
    %c0_i32_1 = arith.constant 0 : i32
    return %c0_i32, %c0_i32_0 : i32, i32
  }
  func.func @transform_2(%arg0: i32) -> (i32, i32) {
    %c0_i32 = arith.constant 0 : i32
    %c0_i32_0 = arith.constant 0 : i32
    %c0_i32_1 = arith.constant 0 : i32
    return %c0_i32, %c0_i32_0 : i32, i32
  }
  func.func @transform_3(%arg0: i32) -> (i32, i32) {
    %c0_i32 = arith.constant 0 : i32
    %c0_i32_0 = arith.constant 0 : i32
    %c0_i32_1 = arith.constant 0 : i32
    return %c0_i32, %c0_i32_0 : i32, i32
  }
  func.func @transform_4(%arg0: i32) -> (i32, i32) {
    %c0_i32 = arith.constant 0 : i32
    %c0_i32_0 = arith.constant 0 : i32
    %c0_i32_1 = arith.constant 0 : i32
    return %c0_i32, %c0_i32_0 : i32, i32
  }
  func.func @transform_5(%arg0: i32) -> (i32, i32) {
    %c0_i32 = arith.constant 0 : i32
    %c0_i32_0 = arith.constant 0 : i32
    return %arg0, %c0_i32 : i32, i32
  }
}

</mosaic_0001>

<bundles_post_ra>
// kernel: discriminator_forward.1
= control target key start
LH: loop header
LB: loop body
LE: loop exit
PB: predicated region body
PF: predicated region fallthrough
CT: control target
= control target key end

     0   :  { %10 = vsyncpa [#allocation3], 0  ;;  %s2453_s21 = smov [#allocation2]   ;;  %s2454_s23 = smov 64   ;;  %s2552_s0 = inlined_call_operand.vmem [shape: bf16[8,2352], index: 0, kind: input, shape index: {}]   ;;  %s2553_s1 = inlined_call_operand.hbm [shape: bf16[2352,128], index: 1, kind: input, shape index: {}]   ;;  %s2554_s2 = inlined_call_operand.vmem [shape: f32[1,128], index: 2, kind: input, shape index: {}]   ;;  %s2555_s3 = inlined_call_operand.vmem [shape: bf16[128,128], index: 3, kind: input, shape index: {}]   ;;  %s2556_s4 = inlined_call_operand.vmem [shape: f32[1,128], index: 4, kind: input, shape index: {}]   ;;  %s2557_s5 = inlined_call_operand.vmem [shape: f32[8,128], index: 5, kind: output, shape index: {}]  }
   0x1   :  { %s17_s20 = sshll.u32 %s2553_s1, 4  ;;  %s19_s22 = sshll.u32 %s2453_s21, 4  ;;  %s18_s20 = int_to_ptr.hbm [resolvable:$true] %s17_s20  ;;  %s20_s22 = int_to_ptr.vmem [resolvable:$true] %s19_s22 }
   0x2   :  { %s2455_s24 = smov 4  }
   0x3   :  { %25 = dma.hbm_to_vmem [thread:$0]  %s18_s20, 18816, %s20_s22, [#allocation3], %s2454_s23, %s2454_s23, %s2455_s24  }
   0x4   :  { %2451 = dma.done.wait [#allocation3], 18816  }
   0x5   :  { %2452 = vsyncadd [#allocation3], 4294948480  ;;  %v2270_v0 = vld [vmem:[#allocation2 + $0x38] sm:$0xff]  ;;  %v2269_v4 = vld [vmem:[#allocation2 + $0x30] sm:$0xff]  ;;  %vm1293_vm0 = vcmask 392192  }
   0x6   :  { %v2278_v1 = vld [vmem:[#allocation2 + $0x78] sm:$0xff]  ;;  %1297 = vmatpush.bf16.msra.mxu0 %v2270_v0  ;;  %v2277_v5 = vld [vmem:[#allocation2 + $0x70] sm:$0xff]  ;;  %v2268_v8 = vld [vmem:[#allocation2 + $0x28] sm:$0xff] }
   0x7   :  { %v2286_v2 = vld [vmem:[#allocation2 + $0xb8] sm:$0xff]  ;;  %1310 = vmatpush.bf16.msra.mxu1 %v2278_v1  ;;  %v2285_v6 = vld [vmem:[#allocation2 + $0xb0] sm:$0xff]  ;;  %v2276_v9 = vld [vmem:[#allocation2 + $0x68] sm:$0xff] }
   0x8   :  { %v2294_v3 = vld [vmem:[#allocation2 + $0xf8] sm:$0xff]  ;;  %1323 = vmatpush.bf16.msra.mxu2 %v2286_v2  ;;  %v2293_v7 = vld [vmem:[#allocation2 + $0xf0] sm:$0xff]  ;;  %v2284_v10 = vld [vmem:[#allocation2 + $0xa8] sm:$0xff] }
   0x9   :  { %1336 = vmatpush.bf16.msra.mxu3 %v2294_v3  ;;  %v2292_v11 = vld [vmem:[#allocation2 + $0xe8] sm:$0xff]  ;;  %v2267_v12 = vld [vmem:[#allocation2 + $0x20] sm:$0xff]  ;;  %v2266_v16 = vld [vmem:[#allocation2 + $0x18] sm:$0xff] }
   0xa   :  { %1298 = vmatpush.bf16.msra.mxu0 %v2269_v4  ;;  %v2275_v13 = vld [vmem:[#allocation2 + $0x60] sm:$0xff]  ;;  %v2274_v17 = vld [vmem:[#allocation2 + $0x58] sm:$0xff]  ;;  %v2265_v20 = vld [vmem:[#allocation2 + $0x10] sm:$0xff] }
   0xb   :  { %1311 = vmatpush.bf16.msra.mxu1 %v2277_v5  ;;  %v2283_v14 = vld [vmem:[#allocation2 + $0xa0] sm:$0xff]  ;;  %v2282_v18 = vld [vmem:[#allocation2 + $0x98] sm:$0xff]  ;;  %v2273_v21 = vld [vmem:[#allocation2 + $0x50] sm:$0xff] }
   0xc   :  { %1324 = vmatpush.bf16.msra.mxu2 %v2285_v6  ;;  %v2291_v15 = vld [vmem:[#allocation2 + $0xe0] sm:$0xff]  ;;  %v2290_v19 = vld [vmem:[#allocation2 + $0xd8] sm:$0xff]  ;;  %v2281_v22 = vld [vmem:[#allocation2 + $0x90] sm:$0xff] }
   0xd   :  { %1337 = vmatpush.bf16.msra.mxu3 %v2293_v7  ;;  %v2289_v23 = vld [vmem:[#allocation2 + $0xd0] sm:$0xff]  ;;  %v2264_v24 = vld [vmem:[#allocation2 + $0x8] sm:$0xff]  ;;  %v37_v26 = vld [vmem:[%s2552_s0] sm:$0xff] }
   0xe   :  { %1299 = vmatpush.bf16.msra.mxu0 %v2268_v8  ;;  %v2272_v25 = vld [vmem:[#allocation2 + $0x48] sm:$0xff]  ;;  %v355_v30 = vunpack.c.l.b16 %v37_v26  ;;  %v2263_v31 = vld [vmem:[#allocation2] sm:$0xff]  ;;  %v2302_v35 = vld [vmem:[#allocation2 + $0x138] sm:$0xff]  ;;  %v356_v36 = vunpack.c.h.b16 %v37_v26 }
   0xf   :  { %1312 = vmatpush.bf16.msra.mxu1 %v2276_v9  ;;  %v2280_v27 = vld [vmem:[#allocation2 + $0x88] sm:$0xff]  ;;  %v2271_v32 = vld [vmem:[#allocation2 + $0x40] sm:$0xff]  ;;  %v2310_v37 = vld [vmem:[#allocation2 + $0x178] sm:$0xff] }
  0x10   :  { %1325 = vmatpush.bf16.msra.mxu2 %v2284_v10  ;;  %v2288_v28 = vld [vmem:[#allocation2 + $0xc8] sm:$0xff]  ;;  %v2279_v34 = vld [vmem:[#allocation2 + $0x80] sm:$0xff]  ;;  %v2318_v38 = vld [vmem:[#allocation2 + $0x1b8] sm:$0xff]  ;;  %v374_v40 = vpack.c.b16 %v355_v30, %v355_v30  ;;  %v375_v45 = vpack.c.b16 %v356_v36, %v356_v36 }
  0x11   :  { %1338 = vmatpush.bf16.msra.mxu3 %v2292_v11  ;;  %v38_v29 = vld [vmem:[%s2552_s0 + $0x8] sm:$0xff]  ;;  %v2287_v39 = vld [vmem:[#allocation2 + $0xc0] sm:$0xff]  ;;  %v2326_v42 = vld [vmem:[#allocation2 + $0x1f8] sm:$0xff] }
  0x12   :  { %1300 = vmatpush.bf16.msra.mxu0 %v2267_v12  ;;  %v357_v33 = vunpack.c.l.b16 %v38_v29  ;;  %v358_v41 = vunpack.c.h.b16 %v38_v29  ;;  %v2301_v44 = vld [vmem:[#allocation2 + $0x130] sm:$0xff]  ;;  %v2300_v50 = vld [vmem:[#allocation2 + $0x128] sm:$0xff]  ;;  %v2299_v54 = vld [vmem:[#allocation2 + $0x120] sm:$0xff] }
  0x13   :  { %1313 = vmatpush.bf16.msra.mxu1 %v2275_v13  ;;  %v2309_v46 = vld [vmem:[#allocation2 + $0x170] sm:$0xff]  ;;  %v2308_v51 = vld [vmem:[#allocation2 + $0x168] sm:$0xff]  ;;  %v2307_v55 = vld [vmem:[#allocation2 + $0x160] sm:$0xff] }
  0x14   :  { %1326 = vmatpush.bf16.msra.mxu2 %v2283_v14  ;;  %v376_v43 = vpack.c.b16 %v357_v33, %v357_v33  ;;  %v2317_v47 = vld [vmem:[#allocation2 + $0x1b0] sm:$0xff]  ;;  %v377_v48 = vpack.c.b16 %v358_v41, %v358_v41  ;;  %v2316_v52 = vld [vmem:[#allocation2 + $0x1a8] sm:$0xff]  ;;  %v2315_v56 = vld [vmem:[#allocation2 + $0x1a0] sm:$0xff] }
  0x15   :  { %1339 = vmatpush.bf16.msra.mxu3 %v2291_v15  ;;  %v2325_v49 = vld [vmem:[#allocation2 + $0x1f0] sm:$0xff]  ;;  %v2324_v53 = vld [vmem:[#allocation2 + $0x1e8] sm:$0xff]  ;;  %v2323_v57 = vld [vmem:[#allocation2 + $0x1e0] sm:$0xff] }
  0x16   :  { %1301 = vmatpush.bf16.msra.mxu0 %v2266_v16  ;;  %v2298_v58 = vld [vmem:[#allocation2 + $0x118] sm:$0xff]  ;;  %v2297_v62 = vld [vmem:[#allocation2 + $0x110] sm:$0xff]  ;;  %v2296_v2 = vld [vmem:[#allocation2 + $0x108] sm:$0xff] }
  0x17   :  { %1314 = vmatpush.bf16.msra.mxu1 %v2274_v17  ;;  %v2306_v59 = vld [vmem:[#allocation2 + $0x158] sm:$0xff]  ;;  %v2305_v63 = vld [vmem:[#allocation2 + $0x150] sm:$0xff]  ;;  %v2304_v3 = vld [vmem:[#allocation2 + $0x148] sm:$0xff] }
  0x18   :  { %1327 = vmatpush.bf16.msra.mxu2 %v2282_v18  ;;  %v2314_v60 = vld [vmem:[#allocation2 + $0x198] sm:$0xff]  ;;  %v2313_v0 = vld [vmem:[#allocation2 + $0x190] sm:$0xff]  ;;  %v2312_v4 = vld [vmem:[#allocation2 + $0x188] sm:$0xff] }
  0x19   :  { %1340 = vmatpush.bf16.msra.mxu3 %v2290_v19  ;;  %v2322_v61 = vld [vmem:[#allocation2 + $0x1d8] sm:$0xff]  ;;  %v2321_v1 = vld [vmem:[#allocation2 + $0x1d0] sm:$0xff]  ;;  %v2320_v7 = vld [vmem:[#allocation2 + $0x1c8] sm:$0xff] }
  0x1a   :  { %1302 = vmatpush.bf16.msra.mxu0 %v2265_v20  ;;  %v40_v5 = vld [vmem:[%s2552_s0 + $0x18] sm:$0xff]  ;;  %v39_v6 = vld [vmem:[%s2552_s0 + $0x10] sm:$0xff]  ;;  %v2295_v8 = vld [vmem:[#allocation2 + $0x100] sm:$0xff] }
  0x1b   :  { %1315 = vmatpush.bf16.msra.mxu1 %v2273_v21  ;;  %v361_v9 = vunpack.c.l.b16 %v40_v5  ;;  %v2303_v10 = vld [vmem:[#allocation2 + $0x140] sm:$0xff]  ;;  %v359_v12 = vunpack.c.l.b16 %v39_v6  ;;  %v360_v13 = vunpack.c.h.b16 %v39_v6  ;;  %v2334_v14 = vld [vmem:[#allocation2 + $0x238] sm:$0xff]  ;;  %v362_v18 = vunpack.c.h.b16 %v40_v5  ;;  %v2340_v29 = vld [vmem:[#allocation2 + $0x268] sm:$0xff] }
  0x1c   :  { %1328 = vmatpush.bf16.msra.mxu2 %v2281_v22  ;;  %v2311_v11 = vld [vmem:[#allocation2 + $0x180] sm:$0xff]  ;;  %v2342_v15 = vld [vmem:[#allocation2 + $0x278] sm:$0xff]  ;;  %v2348_v30 = vld [vmem:[#allocation2 + $0x2a8] sm:$0xff] }
  0x1d   :  { %1341 = vmatpush.bf16.msra.mxu3 %v2289_v23  ;;  %v2350_v16 = vld [vmem:[#allocation2 + $0x2b8] sm:$0xff]  ;;  %v2319_v17 = vld [vmem:[#allocation2 + $0x1c0] sm:$0xff]  ;;  %v380_v20 = vpack.c.b16 %v361_v9, %v361_v9  ;;  %v378_v21 = vpack.c.b16 %v359_v12, %v359_v12  ;;  %v379_v22 = vpack.c.b16 %v360_v13, %v360_v13  ;;  %v2333_v23 = vld [vmem:[#allocation2 + $0x230] sm:$0xff]  ;;  %v381_v26 = vpack.c.b16 %v362_v18, %v362_v18 }
  0x1e   :  { %1303 = vmatpush.bf16.msra.mxu0 %v2264_v24  ;;  %v2358_v19 = vld [vmem:[#allocation2 + $0x2f8] sm:$0xff]  ;;  %v2341_v24 = vld [vmem:[#allocation2 + $0x270] sm:$0xff]  ;;  %v2339_v33 = vld [vmem:[#allocation2 + $0x260] sm:$0xff] }
  0x1f   :  { %1316 = vmatpush.bf16.msra.mxu1 %v2272_v25  ;;  %v2349_v25 = vld [vmem:[#allocation2 + $0x2b0] sm:$0xff]  ;;  %v2330_v36 = vld [vmem:[#allocation2 + $0x218] sm:$0xff]  ;;  %v2364_v6 = vld [vmem:[#allocation2 + $0x328] sm:$0xff] }
  0x20   :  { %1329 = vmatpush.bf16.msra.mxu2 %v2280_v27  ;;  %v2357_v27 = vld [vmem:[#allocation2 + $0x2f0] sm:$0xff]  ;;  %v2388_v9 = vld [vmem:[#allocation2 + $0x3e8] sm:$0xff]  ;;  %v2379_v12 = vld [vmem:[#allocation2 + $0x3a0] sm:$0xff] }
  0x21   :  { %1342 = vmatpush.bf16.msra.mxu3 %v2288_v28  ;;  %v2332_v28 = vld [vmem:[#allocation2 + $0x228] sm:$0xff]  ;;  %v2337_v41 = vld [vmem:[#allocation2 + $0x250] sm:$0xff]  ;;  %v2387_v13 = vld [vmem:[#allocation2 + $0x3e0] sm:$0xff] }
  0x22   :  { %1304 = vmatpush.bf16.msra.mxu0 %v2263_v31  ;;  %v2356_v31 = vld [vmem:[#allocation2 + $0x2e8] sm:$0xff]  ;;  %v2389_v5 = vld [vmem:[#allocation2 + $0x3f0] sm:$0xff] }
  0x23   :  { %1317 = vmatpush.bf16.msra.mxu1 %v2271_v32  ;;  %v2331_v32 = vld [vmem:[#allocation2 + $0x220] sm:$0xff]  ;;  %v2361_v18 = vld [vmem:[#allocation2 + $0x310] sm:$0xff] }
  0x24   :  { %1330 = vmatpush.bf16.msra.mxu2 %v2279_v34  ;;  %v2347_v34 = vld [vmem:[#allocation2 + $0x2a0] sm:$0xff] }
  0x25   :  { %1343 = vmatpush.bf16.msra.mxu3 %v2287_v39  ;;  %1305 = vmatmul.bf16.vlgmr.msra.gmra.mxu0 %v374_v40  ;;  %v2354_v39 = vld [vmem:[#allocation2 + $0x2d8] sm:$0xff]  ;;  %v2329_v40 = vld [vmem:[#allocation2 + $0x210] sm:$0xff] }
  0x26   :  { %1349 = vmatpush.bf16.msrb.mxu0 %v2302_v35  ;;  %1318 = vmatmul.bf16.vlgmr.msra.gmra.mxu1 %v375_v45  ;;  %v2355_v35 = vld [vmem:[#allocation2 + $0x2e0] sm:$0xff]  ;;  %v2336_v45 = vld [vmem:[#allocation2 + $0x248] sm:$0xff] }
  0x27   :  { %1362 = vmatpush.bf16.msrb.mxu1 %v2310_v37  ;;  %1331 = vmatmul.bf16.vlgmr.msra.gmra.mxu2 %v376_v43  ;;  %v2338_v37 = vld [vmem:[#allocation2 + $0x258] sm:$0xff]  ;;  %v2353_v43 = vld [vmem:[#allocation2 + $0x2d0] sm:$0xff] }
  0x28   :  { %1375 = vmatpush.bf16.msrb.mxu2 %v2318_v38  ;;  %1344 = vmatmul.bf16.vlgmr.msra.gmra.mxu3 %v377_v48  ;;  %v2346_v38 = vld [vmem:[#allocation2 + $0x298] sm:$0xff]  ;;  %v42_v48 = vld [vmem:[%s2552_s0 + $0x28] sm:$0xff] }
  0x29   :  { %1388 = vmatpush.bf16.msrb.mxu3 %v2326_v42  ;;  %v2345_v42 = vld [vmem:[#allocation2 + $0x290] sm:$0xff] }
  0x2a   :  { %1350 = vmatpush.bf16.msrb.mxu0 %v2301_v44  ;;  %v2328_v44 = vld [vmem:[#allocation2 + $0x208] sm:$0xff] }
  0x2b   :  { %1363 = vmatpush.bf16.msrb.mxu1 %v2309_v46  ;;  %v41_v46 = vld [vmem:[%s2552_s0 + $0x20] sm:$0xff] }
  0x2c   :  { %1376 = vmatpush.bf16.msrb.mxu2 %v2317_v47  ;;  %v2344_v47 = vld [vmem:[#allocation2 + $0x288] sm:$0xff] }
  0x2d   :  { %1389 = vmatpush.bf16.msrb.mxu3 %v2325_v49  ;;  %v2352_v49 = vld [vmem:[#allocation2 + $0x2c8] sm:$0xff] }
  0x2e   :  { %1351 = vmatpush.bf16.msrb.mxu0 %v2300_v50  ;;  %v363_v50 = vunpack.c.l.b16 %v41_v46 }
  0x2f   :  { %1364 = vmatpush.bf16.msrb.mxu1 %v2308_v51  ;;  %v2327_v51 = vld [vmem:[#allocation2 + $0x200] sm:$0xff] }
  0x30   :  { %1377 = vmatpush.bf16.msrb.mxu2 %v2316_v52  ;;  %v2335_v52 = vld [vmem:[#allocation2 + $0x240] sm:$0xff] }
  0x31   :  { %1390 = vmatpush.bf16.msrb.mxu3 %v2324_v53  ;;  %v365_v53 = vunpack.c.l.b16 %v42_v48 }
  0x32   :  { %1352 = vmatpush.bf16.msrb.mxu0 %v2299_v54  ;;  %v2343_v54 = vld [vmem:[#allocation2 + $0x280] sm:$0xff] }
  0x33   :  { %1365 = vmatpush.bf16.msrb.mxu1 %v2307_v55  ;;  %v2366_v55 = vld [vmem:[#allocation2 + $0x338] sm:$0xff] }
  0x34   :  { %1378 = vmatpush.bf16.msrb.mxu2 %v2315_v56  ;;  %v364_v56 = vunpack.c.h.b16 %v41_v46  ;;  %v2396_v46 = vld [vmem:[#allocation2 + $0x428] sm:$0xff] }
  0x35   :  { %1391 = vmatpush.bf16.msrb.mxu3 %v2323_v57  ;;  %v2374_v57 = vld [vmem:[#allocation2 + $0x378] sm:$0xff] }
  0x36   :  { %1353 = vmatpush.bf16.msrb.mxu0 %v2298_v58  ;;  %v2382_v58 = vld [vmem:[#allocation2 + $0x3b8] sm:$0xff] }
  0x37   :  { %1366 = vmatpush.bf16.msrb.mxu1 %v2306_v59  ;;  %v366_v59 = vunpack.c.h.b16 %v42_v48  ;;  %v2407_v48 = vld [vmem:[#allocation2 + $0x480] sm:$0xff] }
  0x38   :  { %1379 = vmatpush.bf16.msrb.mxu2 %v2314_v60  ;;  %v2351_v60 = vld [vmem:[#allocation2 + $0x2c0] sm:$0xff] }
  0x39   :  { %1392 = vmatpush.bf16.msrb.mxu3 %v2322_v61  ;;  %v382_v61 = vpack.c.b16 %v363_v50, %v363_v50  ;;  %v2403_v50 = vld [vmem:[#allocation2 + $0x460] sm:$0xff] }
  0x3a   :  { %1354 = vmatpush.bf16.msrb.mxu0 %v2297_v62  ;;  %v384_v62 = vpack.c.b16 %v365_v53, %v365_v53 }
  0x3b   :  { %1367 = vmatpush.bf16.msrb.mxu1 %v2305_v63  ;;  %v2390_v63 = vld [vmem:[#allocation2 + $0x3f8] sm:$0xff] }
  0x3c   :  { %1380 = vmatpush.bf16.msrb.mxu2 %v2313_v0  ;;  %v383_v0 = vpack.c.b16 %v364_v56, %v364_v56 }
  0x3d   :  { %1393 = vmatpush.bf16.msrb.mxu3 %v2321_v1  ;;  %v2365_v1 = vld [vmem:[#allocation2 + $0x330] sm:$0xff] }
  0x3e   :  { %1355 = vmatpush.bf16.msrb.mxu0 %v2296_v2  ;;  %v385_v2 = vpack.c.b16 %v366_v59, %v366_v59  ;;  %v45_v59 = vld [vmem:[%s2552_s0 + $0x40] sm:$0xff] }
  0x3f   :  { %1368 = vmatpush.bf16.msrb.mxu1 %v2304_v3  ;;  %v2373_v3 = vld [vmem:[#allocation2 + $0x370] sm:$0xff] }
  0x40   :  { %1381 = vmatpush.bf16.msrb.mxu2 %v2312_v4  ;;  %v2381_v4 = vld [vmem:[#allocation2 + $0x3b0] sm:$0xff] }
  0x41   :  { %1394 = vmatpush.bf16.msrb.mxu3 %v2320_v7  ;;  %v2372_v7 = vld [vmem:[#allocation2 + $0x368] sm:$0xff] }
  0x42   :  { %1356 = vmatpush.bf16.msrb.mxu0 %v2295_v8  ;;  %v2380_v8 = vld [vmem:[#allocation2 + $0x3a8] sm:$0xff] }
  0x43   :  { %1369 = vmatpush.bf16.msrb.mxu1 %v2303_v10  ;;  %v2363_v10 = vld [vmem:[#allocation2 + $0x320] sm:$0xff] }
  0x44   :  { %1382 = vmatpush.bf16.msrb.mxu2 %v2311_v11  ;;  %v2371_v11 = vld [vmem:[#allocation2 + $0x360] sm:$0xff] }
  0x45   :  { %1395 = vmatpush.bf16.msrb.mxu3 %v2319_v17  ;;  %1357 = vmatmul.bf16.vlgmr.msrb.gmra.mxu0 %v378_v21  ;;  %v2386_v17 = vld [vmem:[#allocation2 + $0x3d8] sm:$0xff]  ;;  %v2385_v21 = vld [vmem:[#allocation2 + $0x3d0] sm:$0xff] }
  0x46   :  { %1401 = vmatpush.bf16.msra.mxu0 %v2334_v14  ;;  %1370 = vmatmul.bf16.vlgmr.msrb.gmra.mxu1 %v379_v22  ;;  %v2362_v14 = vld [vmem:[#allocation2 + $0x318] sm:$0xff]  ;;  %v2360_v22 = vld [vmem:[#allocation2 + $0x308] sm:$0xff] }
  0x47   :  { %1414 = vmatpush.bf16.msra.mxu1 %v2342_v15  ;;  %1383 = vmatmul.bf16.vlgmr.msrb.gmra.mxu2 %v380_v20  ;;  %v2370_v15 = vld [vmem:[#allocation2 + $0x358] sm:$0xff]  ;;  %v2377_v20 = vld [vmem:[#allocation2 + $0x390] sm:$0xff] }
  0x48   :  { %1427 = vmatpush.bf16.msra.mxu2 %v2350_v16  ;;  %1396 = vmatmul.bf16.vlgmr.msrb.gmra.mxu3 %v381_v26  ;;  %v2378_v16 = vld [vmem:[#allocation2 + $0x398] sm:$0xff] }
  0x49   :  { %1440 = vmatpush.bf16.msra.mxu3 %v2358_v19  ;;  %v2369_v19 = vld [vmem:[#allocation2 + $0x350] sm:$0xff]  ;;  %v44_v26 = vld [vmem:[%s2552_s0 + $0x38] sm:$0xff] }
  0x4a   :  { %1402 = vmatpush.bf16.msra.mxu0 %v2333_v23  ;;  %v43_v23 = vld [vmem:[%s2552_s0 + $0x30] sm:$0xff] }
  0x4b   :  { %1415 = vmatpush.bf16.msra.mxu1 %v2341_v24  ;;  %v2368_v24 = vld [vmem:[#allocation2 + $0x348] sm:$0xff] }
  0x4c   :  { %1428 = vmatpush.bf16.msra.mxu2 %v2349_v25  ;;  %v2376_v25 = vld [vmem:[#allocation2 + $0x388] sm:$0xff] }
  0x4d   :  { %1441 = vmatpush.bf16.msra.mxu3 %v2357_v27  ;;  %v2384_v27 = vld [vmem:[#allocation2 + $0x3c8] sm:$0xff] }
  0x4e   :  { %1403 = vmatpush.bf16.msra.mxu0 %v2332_v28  ;;  %v367_v28 = vunpack.c.l.b16 %v43_v23 }
  0x4f   :  { %1416 = vmatpush.bf16.msra.mxu1 %v2340_v29  ;;  %v2359_v29 = vld [vmem:[#allocation2 + $0x300] sm:$0xff] }
  0x50   :  { %1429 = vmatpush.bf16.msra.mxu2 %v2348_v30  ;;  %v368_v30 = vunpack.c.h.b16 %v43_v23 }
  0x51   :  { %1442 = vmatpush.bf16.msra.mxu3 %v2356_v31  ;;  %v2367_v31 = vld [vmem:[#allocation2 + $0x340] sm:$0xff] }
  0x52   :  { %1404 = vmatpush.bf16.msra.mxu0 %v2331_v32  ;;  %v2398_v32 = vld [vmem:[#allocation2 + $0x438] sm:$0xff] }
  0x53   :  { %1417 = vmatpush.bf16.msra.mxu1 %v2339_v33  ;;  %v369_v33 = vunpack.c.l.b16 %v44_v26 }
  0x54   :  { %1430 = vmatpush.bf16.msra.mxu2 %v2347_v34  ;;  %v2375_v34 = vld [vmem:[#allocation2 + $0x380] sm:$0xff] }
  0x55   :  { %1443 = vmatpush.bf16.msra.mxu3 %v2355_v35  ;;  %v2406_v35 = vld [vmem:[#allocation2 + $0x478] sm:$0xff] }
  0x56   :  { %1405 = vmatpush.bf16.msra.mxu0 %v2330_v36  ;;  %v370_v36 = vunpack.c.h.b16 %v44_v26  ;;  %v2417_v26 = vld [vmem:[%s2555_s3 + $0x38] sm:$0xff] }
  0x57   :  { %1418 = vmatpush.bf16.msra.mxu1 %v2338_v37  ;;  %v2383_v37 = vld [vmem:[#allocation2 + $0x3c0] sm:$0xff] }
  0x58   :  { %1431 = vmatpush.bf16.msra.mxu2 %v2346_v38  ;;  %v386_v38 = vpack.c.b16 %v367_v28, %v367_v28 }
  0x59   :  { %1444 = vmatpush.bf16.msra.mxu3 %v2354_v39  ;;  %v387_v39 = vpack.c.b16 %v368_v30, %v368_v30 }
  0x5a   :  { %1406 = vmatpush.bf16.msra.mxu0 %v2329_v40  ;;  %v2409_v40 = vld [vmem:[#allocation2 + $0x490] sm:$0xff] }
  0x5b   :  { %1419 = vmatpush.bf16.msra.mxu1 %v2337_v41  ;;  %v388_v41 = vpack.c.b16 %v369_v33, %v369_v33 }
  0x5c   :  { %1432 = vmatpush.bf16.msra.mxu2 %v2345_v42  ;;  %v2397_v42 = vld [vmem:[#allocation2 + $0x430] sm:$0xff] }
  0x5d   :  { %1445 = vmatpush.bf16.msra.mxu3 %v2353_v43  ;;  %v389_v43 = vpack.c.b16 %v370_v36, %v370_v36 }
  0x5e   :  { %1407 = vmatpush.bf16.msra.mxu0 %v2328_v44  ;;  %v2405_v44 = vld [vmem:[#allocation2 + $0x470] sm:$0xff] }
  0x5f   :  { %1420 = vmatpush.bf16.msra.mxu1 %v2336_v45  ;;  %v2408_v45 = vld [vmem:[#allocation2 + $0x488] sm:$0xff] }
  0x60   :  { %1433 = vmatpush.bf16.msra.mxu2 %v2344_v47  ;;  %v2404_v47 = vld [vmem:[#allocation2 + $0x468] sm:$0xff] }
  0x61   :  { %1446 = vmatpush.bf16.msra.mxu3 %v2352_v49  ;;  %v2395_v49 = vld [vmem:[#allocation2 + $0x420] sm:$0xff] }
  0x62   :  { %1408 = vmatpush.bf16.msra.mxu0 %v2327_v51  ;;  %v46_v51 = vld [vmem:[%s2552_s0 + $0x48] sm:$0xf] }
  0x63   :  { %1421 = vmatpush.bf16.msra.mxu1 %v2335_v52  ;;  %v2394_v52 = vld [vmem:[#allocation2 + $0x418] sm:$0xff]  ;;  %v373_v53 = vunpack.c.l.b16 %v46_v51 }
  0x64   :  { %1434 = vmatpush.bf16.msra.mxu2 %v2343_v54  ;;  %v2402_v54 = vld [vmem:[#allocation2 + $0x458] sm:$0xff] }
  0x65   :  { %1447 = vmatpush.bf16.msra.mxu3 %v2351_v60  ;;  %1409 = vmatmul.bf16.vlgmr.msra.gmra.mxu0 %v382_v61  ;;  %v392_v56 = vpack.c.b16 %v373_v53, %v373_v53  ;;  %v2400_v60 = vld [vmem:[#allocation2 + $0x448] sm:$0xff]  ;;  %v371_v61 = vunpack.c.l.b16 %v45_v59 }
  0x66   :  { %1453 = vmatpush.bf16.msrb.mxu0 %v2366_v55  ;;  %1422 = vmatmul.bf16.vlgmr.msra.gmra.mxu1 %v383_v0  ;;  %v2393_v55 = vld [vmem:[#allocation2 + $0x410] sm:$0xff]  ;;  %v2399_v0 = vld [vmem:[#allocation2 + $0x440] sm:$0xff] }
  0x67   :  { %1466 = vmatpush.bf16.msrb.mxu1 %v2374_v57  ;;  %1435 = vmatmul.bf16.vlgmr.msra.gmra.mxu2 %v384_v62  ;;  %v2401_v57 = vld [vmem:[#allocation2 + $0x450] sm:$0xff]  ;;  %v2391_v62 = vld [vmem:[#allocation2 + $0x400] sm:$0xff] }
  0x68   :  { %1479 = vmatpush.bf16.msrb.mxu2 %v2382_v58  ;;  %1448 = vmatmul.bf16.vlgmr.msra.gmra.mxu3 %v385_v2  ;;  %v2392_v58 = vld [vmem:[#allocation2 + $0x408] sm:$0xff] }
  0x69   :  { %1492 = vmatpush.bf16.msrb.mxu3 %v2390_v63  ;;  %v372_v63 = vunpack.c.h.b16 %v45_v59 }
  0x6a   :  { %1454 = vmatpush.bf16.msrb.mxu0 %v2365_v1  ;;  %v390_v1 = vpack.c.b16 %v371_v61, %v371_v61 }
  0x6b   :  { %1467 = vmatpush.bf16.msrb.mxu1 %v2373_v3  ;;  %v391_v2 = vpack.c.b16 %v372_v63, %v372_v63  ;;  %v2421_v3 = vld [vmem:[%s2554_s2] ss:$0 sm:$0xff] }
  0x6c   :  { %1480 = vmatpush.bf16.msrb.mxu2 %v2381_v4 }
  0x6d   :  { %1493 = vmatpush.bf16.msrb.mxu3 %v2389_v5 }
  0x6e   :  { %1455 = vmatpush.bf16.msrb.mxu0 %v2364_v6 }
  0x6f   :  { %1468 = vmatpush.bf16.msrb.mxu1 %v2372_v7 }
  0x70   :  { %1481 = vmatpush.bf16.msrb.mxu2 %v2380_v8 }
  0x71   :  { %1494 = vmatpush.bf16.msrb.mxu3 %v2388_v9 }
  0x72   :  { %1456 = vmatpush.bf16.msrb.mxu0 %v2363_v10 }
  0x73   :  { %1469 = vmatpush.bf16.msrb.mxu1 %v2371_v11 }
  0x74   :  { %1482 = vmatpush.bf16.msrb.mxu2 %v2379_v12 }
  0x75   :  { %1495 = vmatpush.bf16.msrb.mxu3 %v2387_v13 }
  0x76   :  { %1457 = vmatpush.bf16.msrb.mxu0 %v2362_v14 }
  0x77   :  { %1470 = vmatpush.bf16.msrb.mxu1 %v2370_v15 }
  0x78   :  { %1483 = vmatpush.bf16.msrb.mxu2 %v2378_v16 }
  0x79   :  { %1496 = vmatpush.bf16.msrb.mxu3 %v2386_v17 }
  0x7a   :  { %1458 = vmatpush.bf16.msrb.mxu0 %v2361_v18 }
  0x7b   :  { %1471 = vmatpush.bf16.msrb.mxu1 %v2369_v19 }
  0x7c   :  { %1484 = vmatpush.bf16.msrb.mxu2 %v2377_v20 }
  0x7d   :  { %1497 = vmatpush.bf16.msrb.mxu3 %v2385_v21 }
  0x7e   :  { %1459 = vmatpush.bf16.msrb.mxu0 %v2360_v22 }
  0x7f   :  { %1472 = vmatpush.bf16.msrb.mxu1 %v2368_v24 }
  0x80   :  { %1485 = vmatpush.bf16.msrb.mxu2 %v2376_v25 }
  0x81   :  { %1498 = vmatpush.bf16.msrb.mxu3 %v2384_v27 }
  0x82   :  { %1460 = vmatpush.bf16.msrb.mxu0 %v2359_v29  ;;  %v2416_v29 = vld [vmem:[%s2555_s3 + $0x30] sm:$0xff] }
  0x83   :  { %1473 = vmatpush.bf16.msrb.mxu1 %v2367_v31 }
  0x84   :  { %1486 = vmatpush.bf16.msrb.mxu2 %v2375_v34  ;;  %v2414_v34 = vld [vmem:[%s2555_s3 + $0x20] sm:$0xff] }
  0x85   :  { %1499 = vmatpush.bf16.msrb.mxu3 %v2383_v37  ;;  %1461 = vmatmul.bf16.vlgmr.msrb.gmra.mxu0 %v386_v38  ;;  %v2413_v37 = vld [vmem:[%s2555_s3 + $0x18] sm:$0xff] }
  0x86   :  { %1505 = vmatpush.bf16.msra.mxu0 %v2398_v32  ;;  %1474 = vmatmul.bf16.vlgmr.msrb.gmra.mxu1 %v387_v39  ;;  %v2415_v32 = vld [vmem:[%s2555_s3 + $0x28] sm:$0xff]  ;;  %v2412_v39 = vld [vmem:[%s2555_s3 + $0x10] sm:$0xff] }
  0x87   :  { %1518 = vmatpush.bf16.msra.mxu1 %v2406_v35  ;;  %1487 = vmatmul.bf16.vlgmr.msrb.gmra.mxu2 %v388_v41 }
  0x88   :  { %1536 = vmatpush.bf16.msra.mxu2 %v2409_v40  ;;  %1500 = vmatmul.bf16.vlgmr.msrb.gmra.mxu3 %v389_v43  ;;  %v2411_v43 = vld [vmem:[%s2555_s3 + $0x8] sm:$0xff] }
  0x89   :  { %1614 = vmatpush.bf16.msra.mxu3 %v2417_v26 }
  0x8a   :  { %1506 = vmatpush.bf16.msra.mxu0 %v2397_v42 }
  0x8b   :  { %1519 = vmatpush.bf16.msra.mxu1 %v2405_v44 }
  0x8c   :  { %1537 = vmatpush.bf16.msra.mxu2 %v2408_v45  ;;  %v2410_v45 = vld [vmem:[%s2555_s3] sm:$0xff] }
  0x8d   :  { %1615 = vmatpush.bf16.msra.mxu3 %v2416_v29 }
  0x8e   :  { %1507 = vmatpush.bf16.msra.mxu0 %v2396_v46 }
  0x8f   :  { %1520 = vmatpush.bf16.msra.mxu1 %v2404_v47 }
  0x90   :  { %1538 = vmatpush.bf16.msra.mxu2 %v2407_v48 }
  0x91   :  { %1616 = vmatpush.bf16.msra.mxu3 %v2415_v32 }
  0x92   :  { %1508 = vmatpush.bf16.msra.mxu0 %v2395_v49 }
  0x93   :  { %1521 = vmatpush.bf16.msra.mxu1 %v2403_v50 }
  0x95   :  { %1617 = vmatpush.bf16.msra.mxu3 %v2414_v34 }
  0x96   :  { %1509 = vmatpush.bf16.msra.mxu0 %v2394_v52 }
  0x97   :  { %1522 = vmatpush.bf16.msra.mxu1 %v2402_v54  ;;  %2230 = vmatmul.msk.bf16.vlgmr.msra.gmra.mxu2 %vm1293_vm0, %v392_v56 }
  0x99   :  { %1618 = vmatpush.bf16.msra.mxu3 %v2413_v37 }
  0x9a   :  { %1510 = vmatpush.bf16.msra.mxu0 %v2393_v55 }
  0x9b   :  { %1523 = vmatpush.bf16.msra.mxu1 %v2401_v57 }
  0x9d   :  { %1619 = vmatpush.bf16.msra.mxu3 %v2412_v39 }
  0x9e   :  { %1511 = vmatpush.bf16.msra.mxu0 %v2392_v58 }
  0x9f   :  { %1524 = vmatpush.bf16.msra.mxu1 %v2400_v60 }
  0xa1   :  { %1620 = vmatpush.bf16.msra.mxu3 %v2411_v43 }
  0xa2   :  { %1512 = vmatpush.bf16.msra.mxu0 %v2391_v62  ;;  %v1306_v4 = vpop.f32.mrf.mxu0 }
  0xa3   :  { %1525 = vmatpush.bf16.msra.mxu1 %v2399_v0  ;;  %v1307_v5 = vadd.f32 %v2421_v3, %v1306_v4  ;;  %v1319_v6 = vpop.f32.mrf.mxu1 }
  0xa5   :  { %1513 = vmatmul.bf16.vlgmr.msra.gmra.mxu0 %v390_v1  ;;  %v1320_v7 = vadd.f32 %v1319_v6, %v1307_v5  ;;  %1621 = vmatpush.bf16.msra.mxu3 %v2410_v45 }
  0xa6   :  { %1526 = vmatmul.bf16.vlgmr.msra.gmra.mxu1 %v391_v2 }
  0xaa   :  { %v1332_v8 = vpop.f32.mrf.mxu2  ;;  %v1308_v10 = vpop.f32.mrf.mxu0 }
  0xab   :  { %v1333_v9 = vadd.f32 %v1332_v8, %v1320_v7  ;;  %v1345_v11 = vpop.f32.mrf.mxu3  ;;  %v1321_v12 = vpop.f32.mrf.mxu1  ;;  %v2422_v7 = vld [vmem:[%s2556_s4] ss:$0 sm:$0xff] }
  0xad   :  { %v1346_v13 = vadd.f32 %v1345_v11, %v1333_v9 }
  0xb2   :  { %v1334_v14 = vpop.f32.mrf.mxu2 }
  0xb3   :  { %v1347_v15 = vpop.f32.mrf.mxu3 }
  0xc2   :  { %v1358_v16 = vpop.f32.mrf.mxu0 }
  0xc3   :  { %v1371_v17 = vpop.f32.mrf.mxu1  ;;  %v1359_v36 = vadd.f32 %v1358_v16, %v1346_v13 }
  0xc5   :  { %v1372_v38 = vadd.f32 %v1371_v17, %v1359_v36 }
  0xca   :  { %v1384_v18 = vpop.f32.mrf.mxu2  ;;  %v1360_v20 = vpop.f32.mrf.mxu0 }
  0xcb   :  { %v1397_v19 = vpop.f32.mrf.mxu3  ;;  %v1373_v21 = vpop.f32.mrf.mxu1  ;;  %v1385_v40 = vadd.f32 %v1384_v18, %v1372_v38 }
  0xcd   :  { %v1398_v44 = vadd.f32 %v1397_v19, %v1385_v40 }
  0xd2   :  { %v1386_v22 = vpop.f32.mrf.mxu2 }
  0xd3   :  { %v1399_v23 = vpop.f32.mrf.mxu3 }
  0xe2   :  { %v1410_v24 = vpop.f32.mrf.mxu0 }
  0xe3   :  { %v1423_v25 = vpop.f32.mrf.mxu1  ;;  %v1411_v46 = vadd.f32 %v1410_v24, %v1398_v44 }
  0xe5   :  { %v1424_v51 = vadd.f32 %v1423_v25, %v1411_v46 }
  0xea   :  { %v1436_v27 = vpop.f32.mrf.mxu2  ;;  %v1412_v28 = vpop.f32.mrf.mxu0 }
  0xeb   :  { %v1449_v30 = vpop.f32.mrf.mxu3  ;;  %v1425_v31 = vpop.f32.mrf.mxu1  ;;  %v1437_v52 = vadd.f32 %v1436_v27, %v1424_v51 }
  0xed   :  { %v1450_v53 = vadd.f32 %v1449_v30, %v1437_v52 }
  0xf2   :  { %v1438_v33 = vpop.f32.mrf.mxu2 }
  0xf3   :  { %v1451_v35 = vpop.f32.mrf.mxu3 }
 0x102   :  { %v1462_v41 = vpop.f32.mrf.mxu0 }
 0x103   :  { %v1475_v42 = vpop.f32.mrf.mxu1  ;;  %v1463_v56 = vadd.f32 %v1462_v41, %v1450_v53 }
 0x105   :  { %v1476_v57 = vadd.f32 %v1475_v42, %v1463_v56 }
 0x10a   :  { %v1488_v47 = vpop.f32.mrf.mxu2  ;;  %v1464_v48 = vpop.f32.mrf.mxu0 }
 0x10b   :  { %v1501_v49 = vpop.f32.mrf.mxu3  ;;  %v1477_v50 = vpop.f32.mrf.mxu1  ;;  %v1489_v58 = vadd.f32 %v1488_v47, %v1476_v57 }
 0x10d   :  { %v1502_v60 = vadd.f32 %v1501_v49, %v1489_v58 }
 0x112   :  { %v1490_v54 = vpop.f32.mrf.mxu2 }
 0x113   :  { %v1503_v55 = vpop.f32.mrf.mxu3 }
 0x11a   :  { %v1540_v59 = vpop.f32.mrf.mxu2 }
 0x122   :  { %v1514_v61 = vpop.f32.mrf.mxu0  ;;  %v1542_v1 = vpop.f32.mrf.mxu2 }
 0x123   :  { %v1515_v62 = vadd.f32 %v1514_v61, %v1502_v60  ;;  %v1527_v63 = vpop.f32.mrf.mxu1 }
 0x125   :  { %v1528_v0 = vadd.f32 %v1527_v63, %v1515_v62 }
 0x127   :  { %v1541_v2 = vadd.f32 %v1540_v59, %v1528_v0 }
 0x129   :  { %v1544_v3 = vmax.f32 %v1541_v2, 0.0 }
 0x12a   :  { %v1516_v4 = vpop.f32.mrf.mxu0 }
 0x12b   :  { %v1545_v5 = vpack.c.bf16 %v1544_v3, %v1544_v3  ;;  %v1529_v6 = vpop.f32.mrf.mxu1 }
 0x12d   :  { %1622 = vmatmul.bf16.vlgmr.msra.gmra.mxu3 %v1545_v5 }
 0x1b0   :  { %v1623_v8 = vpop.f32.mrf.mxu3 }
 0x1b1   :  { %v1624_v9 = vadd.f32 %v2422_v7, %v1623_v8 }
 0x1b3   :  { %1627 = vmax.xlane.f32.xlu0 %v1624_v9 }
 0x1b8   :  { %v1625_v10 = vpop.f32.mrf.mxu3 }
 0x226   :  { %v1628_v11 = vpop.xlane.xlu0 %1627 }
 0x227   :  { %v1629_v12 = vsub.f32 %v1624_v9, %v1628_v11 }
 0x229   :  { %v1630_v13 = vmul.f32 1.442695, %v1629_v12 }
 0x22b   :  { %2423 = vpow2.f32 %v1630_v13 }
 0x231   :  { %v2424_v14 = vpop.eup %2423 }
 0x232   :  { %1632 = vadd.xlane.f32.xlu0 %v2424_v14 }
 0x2a5   :  { %v1633_v15 = vpop.xlane.xlu0 %1632 }
 0x2a6   :  { %2425 = vrcp.f32 %v1633_v15 }
 0x2ac   :  { %v2426_v16 = vpop.eup %2425 }
 0x2ad   :  { %v1635_v17 = vmul.f32 %v2426_v16, %v2424_v14 }
 0x2af   :  { %1636 = vst [vmem:[%s2557_s5] sm:$0xff] %v1635_v17 }
 0x2b0   :  { %1641 = vsyncpa [#allocation3], 1 }

</bundles_post_ra>
